<compile_context>
chip_gen: v7x
topology: tpu7x:2x2x1
jax: 0.10.0
libtpu: 0.0.40
codegen_flags: <defaults>
</compile_context>

<pallas_src>
import jax
import jax.numpy as jnp
from jax import lax
from jax.experimental import pallas as pl
from jax.experimental.pallas import tpu as pltpu


def _rescal_kernel(e_rows_ref, e_all_ref, r_ref, o_ref):
    # e_rows_ref: (TM, D)   row tile of E for this (r, i) grid step
    # e_all_ref:  (Np, D)   full (padded) entity matrix, resident across grid
    # r_ref:      (1, D, D) relation matrix for this relation
    # o_ref:      (TM, Np)  score slab: rows i*TM.., columns r*Np.. of (Np, R*Np)
    e_rows = e_rows_ref[...]
    rk = r_ref[0]
    tmp = jnp.dot(e_rows, rk, preferred_element_type=jnp.float32)     # (TM, D)  MXU
    # (TM, D) x (Np, D) contracted on D -> (TM, Np); no e.T materialization.
    o_ref[...] = lax.dot_general(
        tmp, e_all_ref[...],
        dimension_numbers=(((1,), (1,)), ((), ())),
        preferred_element_type=jnp.float32)                           # MXU


def _round_up(x, m):
    return (x + m - 1) // m * m


def rescal(entity_vectors, relation_matrices, *, tm=256):
    """entity_vectors (N, D) f32, relation_matrices (R, D, D) f32 -> (N, R, N) f32."""
    N, D = entity_vectors.shape
    R = relation_matrices.shape[0]

    # Pad entity count to a lane-dense multiple of 128 (unmasked stores,
    # MXU-friendly tiles); padding rows are zeros and are sliced off below.
    Np = _round_up(N, 128)
    TM = min(tm, Np)
    while Np % TM != 0:
        TM //= 2
    TM = max(TM, 8)

    e = entity_vectors.astype(jnp.float32)
    if Np != N:
        e = jnp.pad(e, ((0, Np - N), (0, 0)))
    rel = relation_matrices.astype(jnp.float32)

    # TODO(synk): optionally cast operands to bf16 (f32 accumulate) for MXU peak
    # on v5e/v6e/v7x if the model tolerates the precision loss.
    scores_flat = pl.pallas_call(
        _rescal_kernel,
        out_shape=jax.ShapeDtypeStruct((Np, R * Np), jnp.float32),
        grid_spec=pltpu.PrefetchScalarGridSpec(
            num_scalar_prefetch=0,
            grid=(R, Np // TM),
            in_specs=[
                # row tile of E for this step
                pl.BlockSpec((TM, D), lambda r, i: (i, 0)),
                # full (padded) E, resident (same block every step)
                pl.BlockSpec((Np, D), lambda r, i: (0, 0)),
                # one relation matrix per outer grid index
                pl.BlockSpec((1, D, D), lambda r, i: (r, 0, 0)),
            ],
            # write rows i*TM..i*TM+TM at column offset r*Np of (Np, R*Np)
            out_specs=pl.BlockSpec((TM, Np), lambda r, i: (i, r)),
        ),
        compiler_params=pltpu.CompilerParams(
            dimension_semantics=("parallel", "parallel"),
            vmem_limit_bytes=48 * 1024 * 1024,  # headroom under v7x's 64 MiB
        ),
    )(e, e, rel)

    # (Np, R*Np) -> (Np, R, Np) is a free metadata reshape; drop padding.
    return scores_flat.reshape(Np, R, Np)[:N, :, :N]


if __name__ == "__main__":
    key = jax.random.PRNGKey(0)
    k_e, k_r = jax.random.split(key)

    N, D, R = 16, 32, 4  # small synthetic shapes
    entity_vectors = jax.random.normal(k_e, (N, D), dtype=jnp.float32)
    relation_matrices = jax.random.normal(k_r, (R, D, D), dtype=jnp.float32)

    scores = rescal(entity_vectors, relation_matrices)
    scores = jax.block_until_ready(scores)

    # Reference check against plain-JAX einsum of the same semantics.
    ref = jnp.einsum("nd,rde,me->nrm", entity_vectors, relation_matrices,
                     entity_vectors)
    assert scores.shape == (N, R, N)
    assert jnp.allclose(scores, ref, atol=1e-3, rtol=1e-3)

    print("KERNEL_OK")
</pallas_src>

<mosaic_0001>
module attributes {stable_mosaic.version = 11 : i64} {
  func.func @_rescal_kernel(%arg0: i32, %arg1: i32, %arg2: memref<128x32xf32, #tpu.memory_space<vmem>>, %arg3: memref<128x32xf32, #tpu.memory_space<vmem>>, %arg4: memref<1x32x32xf32, #tpu.memory_space<vmem>>, %arg5: memref<128x128xf32, #tpu.memory_space<vmem>>) attributes {dimension_semantics = [#tpu.dimension_semantics<parallel>, #tpu.dimension_semantics<parallel>], iteration_bounds = array<i64: 4, 1>, scalar_prefetch = 0 : i64, scratch_operands = 0 : i64, tpu.core_type = #tpu.core_type<tc>, window_params = [{transform_indices = @transform_0, window_bounds = array<i64: 128, 32>}, {pipeline_mode = #tpu.pipeline_mode<synchronous>, transform_indices = @transform_1, window_bounds = array<i64: 128, 32>}, {transform_indices = @transform_2, window_bounds = array<i64: 1, 32, 32>}, {transform_indices = @transform_3, window_bounds = array<i64: 128, 128>}]} {
    %c0 = arith.constant 0 : index
    %c0_0 = arith.constant 0 : index
    %0 = vector.load %arg2[%c0, %c0_0] : memref<128x32xf32, #tpu.memory_space<vmem>>, vector<128x32xf32>
    %c0_1 = arith.constant 0 : index
    %c0_2 = arith.constant 0 : index
    %c0_3 = arith.constant 0 : index
    %1 = vector.load %arg4[%c0_1, %c0_2, %c0_3] : memref<1x32x32xf32, #tpu.memory_space<vmem>>, vector<1x32x32xf32>
    %2 = vector.shape_cast %1 : vector<1x32x32xf32> to vector<32x32xf32>
    %cst = arith.constant dense<0.000000e+00> : vector<128x32xf32>
    %3 = tpu.matmul %0, %2, %cst {dimension_numbers = #tpu.dot_dimension_numbers<[1], [0], [0], [1], [0, 0, 1, 1], [], []>} : vector<128x32xf32>, vector<32x32xf32>, vector<128x32xf32> -> vector<128x32xf32>
    %c0_4 = arith.constant 0 : index
    %c0_5 = arith.constant 0 : index
    %4 = vector.load %arg3[%c0_4, %c0_5] : memref<128x32xf32, #tpu.memory_space<vmem>>, vector<128x32xf32>
    %cst_6 = arith.constant dense<0.000000e+00> : vector<128x128xf32>
    %5 = tpu.matmul %3, %4, %cst_6 {dimension_numbers = #tpu.dot_dimension_numbers<[1], [1], [0], [0], [0, 0, 1, 0], [], []>} : vector<128x32xf32>, vector<128x32xf32>, vector<128x128xf32> -> vector<128x128xf32>
    %c0_7 = arith.constant 0 : index
    %c0_8 = arith.constant 0 : index
    %6 = vector.load %arg5[%c0_7, %c0_8] : memref<128x128xf32, #tpu.memory_space<vmem>>, vector<128x128xf32>
    tpu.vector_store %arg5[%c0_7, %c0_8], %5 {strides = array<i32>} : memref<128x128xf32, #tpu.memory_space<vmem>>, vector<128x128xf32>,
    return
  }
  func.func @transform_0(%arg0: i32, %arg1: i32) -> (i32, i32) {
    %c0_i32 = arith.constant 0 : i32
    %c0_i32_0 = arith.constant 0 : i32
    return %arg1, %c0_i32 : i32, i32
  }
  func.func @transform_1(%arg0: i32, %arg1: i32) -> (i32, i32) {
    %c0_i32 = arith.constant 0 : i32
    %c0_i32_0 = arith.constant 0 : i32
    %c0_i32_1 = arith.constant 0 : i32
    return %c0_i32, %c0_i32_0 : i32, i32
  }
  func.func @transform_2(%arg0: i32, %arg1: i32) -> (i32, i32, i32) {
    %c0_i32 = arith.constant 0 : i32
    %c0_i32_0 = arith.constant 0 : i32
    %c0_i32_1 = arith.constant 0 : i32
    return %arg0, %c0_i32, %c0_i32_0 : i32, i32, i32
  }
  func.func @transform_3(%arg0: i32, %arg1: i32) -> (i32, i32) {
    %c0_i32 = arith.constant 0 : i32
    return %arg1, %arg0 : i32, i32
  }
}

</mosaic_0001>

<bundles_post_ra>
// kernel: tpu_custom_call.1
= control target key start
LH: loop header
LB: loop body
LE: loop exit
PB: predicated region body
PF: predicated region fallthrough
CT: control target
= control target key end

     0   :  { %8 = vsyncpa [#allocation3], 0  ;;  %s1568_s0 = inlined_call_operand.vmem [shape: f32[128,32], index: 0, kind: input, shape index: {}]   ;;  %s1569_s1 = inlined_call_operand.vmem [shape: f32[128,32], index: 1, kind: input, shape index: {}]   ;;  %s1570_s2 = inlined_call_operand.vmem [shape: f32[4,32,32], index: 2, kind: input, shape index: {}]   ;;  %s1571_s3 = inlined_call_operand.hbm [shape: f32[128,512], index: 3, kind: output, shape index: {}]  }
   0x1   :  { %10 = vsyncpa [#allocation3 + $0x1], 0  ;;  %s1232_s12 = smov 0   ;;  %s1234_s13 = smov 0  }
   0x2   :  { %s1236_s14 = smov 0   ;;  %s1238_s15 = smov 0  }
   0x3   :  { %s1240_s16 = smov 0   ;;  %s1242_s17 = smov 0  }
   0x4 LB: > { %s796_s18 = sadd.s32 4294967295, %s1206_s17   ;;  %s797_s19 = sadd.s32 4294967294, %s1206_s17   ;;  %s1206_s17 = sphi %s1242_s17, %s16_s17   ;;  %s1202_s16 = sphi %s1240_s16, %s1580_s16   ;;  %s1198_s15 = sphi %s1238_s15, %s1579_s15   ;;  %s1194_s14 = sphi %s1236_s14, %s1578_s14   ;;  %s1190_s13 = sphi %s1234_s13, %s1577_s13   ;;  %s1186_s12 = sphi %s1232_s12, %s1576_s12  }
   0x5   : > { %s28_s20 = sadd.s32 1, %s1202_s16  ;;  %s110_s21 = sadd.s32 1, %s1194_s14 }
   0x6   : > { %p30_p0 = scmp.ge.s32.totalorder %s28_s20, 4  ;;  %p120_p1 = scmp.ne.s32.totalorder %s1194_s14, %s1190_s13 }
   0x7   : > { %p121_p2 = scmp.eq.s32.totalorder %s796_s18, 3  ;;  %p126_p3 = scmp.ne.s32.totalorder %s1190_s13, %s1186_s12 }
   0x8   : > { %s1582_s20 = smov (%p30_p0, %s28_s20), 0  ;;  %p127_p5 = scmp.eq.s32.totalorder %s797_s19, 3 }
   0x9   : > { %p1272_p4 = por %p121_p2, %p120_p1  ;;  %s106_s23 = ssub.s32 %s1202_s16, %s1582_s20 }
   0xa   : > { %p801_p6 = scmp.ge.s32.totalorder %s1206_s17, 1  ;;  %p108_p7 = scmp.eq.s32.totalorder %s106_s23, 0 }
   0xb   : > { %p1279_p8 = por %p127_p5, %p126_p3  ;;  %p165_p9 = scmp.lt.s32.totalorder %s1206_s17, 5 }
   0xc   : > { %s1285_s25 = scalar_select %p108_p7, %s1194_s14, %s110_s21  }
   0xd   : > { %p166_p10 = pnand %p801_p6, %p165_p9 }
   0xe   : > { %p200_p11 = scmp.lt.s32.totalorder (!%p166_p10), %s1198_s15, 3  ;;  %v206_v0 = vld [vmem:[%s1568_s0] sm:$0xff] (!%p166_p10)  ;;  %vm226_vm0 = vcmask (!%p166_p10), 261120   ;;  %v421_v2 = vld [vmem:[%s1569_s1 + $0x8] sm:$0xff] (!%p166_p10)  ;;  %v422_v10 = vld [vmem:[%s1569_s1 + $0x10] sm:$0xff] (!%p166_p10)  ;;  %s191_s27 = sand.u32 (!%p166_p10), 1, %s1190_s13  }
   0xf   : > { %169 = sbr.rel (%p166_p10) target bundleno = 508 (0x1fc), region = 32  ;;  %918 = vmatprep.mubr.msk.f32.mxu0 (!%p166_p10), %vm226_vm0, %v206_v0  ;;  %v420_v1 = vld [vmem:[%s1569_s1] sm:$0xff] (!%p166_p10)  ;;  %vm1304_vm1 = vmpackc.low (!%p166_p10), %vm226_vm0, %vm226_vm0  ;;  %v423_v12 = vld [vmem:[%s1569_s1 + $0x18] sm:$0xff] (!%p166_p10)  ;;  %s854_s30 = sshll.u32 (!%p166_p10), %s1198_s15, 7 }
  0x10   : > { %v1006_v6 = vpack.c.bf16 (!%p166_p10), %v421_v2, %v420_v1  ;;  %v1012_v13 = vpack.c.bf16 (!%p166_p10), %v423_v12, %v422_v10  ;;  %v424_v14 = vld [vmem:[%s1569_s1 + $0x20] sm:$0xff] (!%p166_p10)  ;;  %v425_v15 = vld [vmem:[%s1569_s1 + $0x28] sm:$0xff] (!%p166_p10)  ;;  %v208_v17 = vld [vmem:[%s1568_s0 + $0x10] sm:$0xff] (!%p166_p10)  ;;  %s1514_s7 = scalar_lea.hbm (!%p166_p10), %s1571_s3, %s854_s30  ;;  %s1208_s9 = smov (!%p166_p10), [#allocation2]  }
  0x11   : > { %v207_v16 = vld [vmem:[%s1568_s0 + $0x8] sm:$0xff] (!%p166_p10)  ;;  %v1018_v18 = vpack.c.bf16 (!%p166_p10), %v425_v15, %v424_v14  ;;  %v209_v19 = vld [vmem:[%s1568_s0 + $0x18] sm:$0xff] (!%p166_p10)  ;;  %v210_v20 = vld [vmem:[%s1568_s0 + $0x20] sm:$0xff] (!%p166_p10)  ;;  %s1132_s10 = sshll.u32 (!%p166_p10), %s1208_s9, 4  ;;  %s1133_s10 = int_to_ptr.vmem [resolvable:$false] %s1132_s10 }
  0x12   : > { %1054 = vmatprep.subr.msk.bf16.mxu1 (!%p166_p10), %vm1304_vm1, %v1006_v6  ;;  %v426_v21 = vld [vmem:[%s1569_s1 + $0x30] sm:$0xff] (!%p166_p10)  ;;  %v427_v22 = vld [vmem:[%s1569_s1 + $0x38] sm:$0xff] (!%p166_p10)  ;;  %v211_v23 = vld [vmem:[%s1568_s0 + $0x28] sm:$0xff] (!%p166_p10)  ;;  %s1134_s11 = scalar_lea.vmem (!%p166_p10), %s1133_s10, 4096 }
  0x13   : > { %1062 = vmatpush3.bf16.xpose.msk.msra.mxu1 (!%p166_p10), %vm1304_vm1, %v1006_v6  ;;  %v212_v24 = vld [vmem:[%s1568_s0 + $0x30] sm:$0xff] (!%p166_p10)  ;;  %v1024_v25 = vpack.c.bf16 (!%p166_p10), %v427_v22, %v426_v21  ;;  %v213_v26 = vld [vmem:[%s1568_s0 + $0x38] sm:$0xff] (!%p166_p10)  ;;  %v214_v27 = vld [vmem:[%s1568_s0 + $0x40] sm:$0xff] (!%p166_p10) }
  0x14   : > { %1055 = vmatprep.subr.msk.bf16.mxu1 (!%p166_p10), %vm1304_vm1, %v1012_v13  ;;  %v428_v28 = vld [vmem:[%s1569_s1 + $0x40] sm:$0xff] (!%p166_p10)  ;;  %v429_v29 = vld [vmem:[%s1569_s1 + $0x48] sm:$0xff] (!%p166_p10)  ;;  %v216_v31 = vld [vmem:[%s1568_s0 + $0x50] sm:$0xff] (!%p166_p10) }
  0x15   : > { %v215_v30 = vld [vmem:[%s1568_s0 + $0x48] sm:$0xff] (!%p166_p10)  ;;  %v1030_v32 = vpack.c.bf16 (!%p166_p10), %v429_v29, %v428_v28  ;;  %v217_v33 = vld [vmem:[%s1568_s0 + $0x58] sm:$0xff] (!%p166_p10)  ;;  %v218_v34 = vld [vmem:[%s1568_s0 + $0x60] sm:$0xff] (!%p166_p10) }
  0x16   : > { %s201_s28 = scalar_select %p200_p11, %s1198_s15, 3  ;;  %v430_v35 = vld [vmem:[%s1569_s1 + $0x50] sm:$0xff]  ;;  %v431_v36 = vld [vmem:[%s1569_s1 + $0x58] sm:$0xff]  ;;  %v219_v37 = vld [vmem:[%s1568_s0 + $0x68] sm:$0xff] }
  0x17   : > { %v220_v38 = vld [vmem:[%s1568_s0 + $0x70] sm:$0xff]  ;;  %v1036_v39 = vpack.c.bf16 %v431_v36, %v430_v35  ;;  %v221_v40 = vld [vmem:[%s1568_s0 + $0x78] sm:$0xff]  ;;  %v432_v41 = vld [vmem:[%s1569_s1 + $0x60] sm:$0xff]  ;;  %s1522_s15 = scalar_lea.sflag [#allocation3], %s191_s27 }
  0x18   : > { %s857_s29 = sshll.u32 %s201_s28, 5  ;;  %v433_v42 = vld [vmem:[%s1569_s1 + $0x68] sm:$0xff]  ;;  %v434_v44 = vld [vmem:[%s1569_s1 + $0x70] sm:$0xff]  ;;  %v435_v45 = vld [vmem:[%s1569_s1 + $0x78] sm:$0xff]  ;;  %s802_s28 = sshll.u32 %s191_s27, 7 }
  0x19   : > { %s204_s5 = scalar_lea.vmem %s1570_s2, %s857_s29  ;;  %v1042_v43 = vpack.c.bf16 %v433_v42, %v432_v41  ;;  %v1048_v46 = vpack.c.bf16 %v435_v45, %v434_v44  ;;  %s1493_s29 = scalar_lea.vmem [#allocation2], %s802_s28 }
  0x1a   : > { %v222_v3 = vld [vmem:[%s204_s5] sm:$0xff]  ;;  %v223_v4 = vld [vmem:[%s204_s5 + $0x8] sm:$0xff]  ;;  %v224_v5 = vld [vmem:[%s204_s5 + $0x10] sm:$0xff]  ;;  %s709_s4 = sshll.u32 %s1493_s29, 4  ;;  %s1516_s4 = int_to_ptr.vmem [resolvable:$true] %s709_s4 }
  0x1b   : > { %v998_v7 = vpack.c.bf16 %v223_v4, %v222_v3  ;;  %v225_v8 = vld [vmem:[%s204_s5 + $0x18] sm:$0xff]  ;;  %1063 = vmatpush3.bf16.xpose.msk.msra.mxu1 %vm1304_vm1, %v1012_v13  ;;  %s1128_s8 = scalar_lea.vmem %s1516_s4, 2048  ;;  %p1135_p1 = scmp.lt.s32.totalorder %s1516_s4, %s1133_s10 }
  0x1c   : > { %v1002_v11 = vpack.c.bf16 %v225_v8, %v224_v5  ;;  %1056 = vmatprep.subr.msk.bf16.mxu1 %vm1304_vm1, %v1018_v18  ;;  %p1129_p12 = scmp.ne.s32.totalorder %s1516_s4, %s1128_s8  ;;  %p1136_p2 = scmp.lt.s32.totalorder %s1134_s11, %s1128_s8 }
  0x1d   : > { %999 = vmatprep.subr.bf16.mxu0 %v998_v7 }
  0x1e   : > { %1001 = vmatpush3.bf16.msra.mxu0 %v998_v7  ;;  %p1130_p13 = pnand %p1129_p12, %p1272_p4  ;;  %p1137_p3 = por %p1136_p2, %p1135_p1 }
  0x1f   : > { %1003 = vmatprep.subr.bf16.mxu0 %v1002_v11 }
  0x20   : > { %p1131_p0 = pneg %p1130_p13 }
  0x22   : > { %1005 = vmatpush3.bf16.msra.mxu0 %v1002_v11  ;;  %p1138_p5 = pnand %p1137_p3, %p1131_p0 }
  0x23   : > { %1008 = vmatprep.subr.msk.bf16.mxu0 %vm1304_vm1, %v1006_v6  ;;  %1064 = vmatpush3.bf16.xpose.msk.msra.mxu1 %vm1304_vm1, %v1018_v18 }
  0x24   : > { %1057 = vmatprep.subr.msk.bf16.mxu1 %vm1304_vm1, %v1024_v25 }
  0x25   : > { %919 = vmatmul.mubr.msk.f32.vlgmr.msra.gmra.mrb[0].mxu0 %vm226_vm0, %v207_v16 }
  0x26   : > { %921 = vmatprep.mubr.msk.f32.mxu0 %vm226_vm0, %v208_v17 }
  0x29   : > { %922 = vmatmul.mubr.msk.f32.gmra.mrb[2].mxu0 %vm226_vm0, %v209_v19 }
  0x2a   : > { %924 = vmatprep.mubr.msk.f32.mxu0 %vm226_vm0, %v210_v20 }
  0x2b   : > { %1011 = vmatpush3.bf16.xpose.msk.msra.mxu0 %vm1304_vm1, %v1006_v6  ;;  %1065 = vmatpush3.bf16.xpose.msk.msra.mxu1 %vm1304_vm1, %v1024_v25 }
  0x2c   : > { %1014 = vmatprep.subr.msk.bf16.mxu0 %vm1304_vm1, %v1012_v13  ;;  %1058 = vmatprep.subr.msk.bf16.mxu1 %vm1304_vm1, %v1030_v32 }
  0x2d   : > { %925 = vmatmul.mubr.msk.f32.gmra.mrb[4].mxu0 %vm226_vm0, %v211_v23 }
  0x2e   : > { %927 = vmatprep.mubr.msk.f32.mxu0 %vm226_vm0, %v212_v24 }
  0x31   : > { %928 = vmatmul.mubr.msk.f32.gmra.mrb[6].mxu0 %vm226_vm0, %v213_v26 }
  0x32   : > { %930 = vmatprep.mubr.msk.f32.mxu0 %vm226_vm0, %v214_v27 }
  0x33   : > { %1017 = vmatpush3.bf16.xpose.msk.msra.mxu0 %vm1304_vm1, %v1012_v13  ;;  %1066 = vmatpush3.bf16.xpose.msk.msra.mxu1 %vm1304_vm1, %v1030_v32 }
  0x34   : > { %1020 = vmatprep.subr.msk.bf16.mxu0 %vm1304_vm1, %v1018_v18  ;;  %1059 = vmatprep.subr.msk.bf16.mxu1 %vm1304_vm1, %v1036_v39 }
  0x35   : > { %931 = vmatmul.mubr.msk.f32.gmra.mrb[8].mxu0 %vm226_vm0, %v215_v30 }
  0x36   : > { %933 = vmatprep.mubr.msk.f32.mxu0 %vm226_vm0, %v216_v31 }
  0x39   : > { %934 = vmatmul.mubr.msk.f32.gmra.mrb[10].mxu0 %vm226_vm0, %v217_v33 }
  0x3a   : > { %936 = vmatprep.mubr.msk.f32.mxu0 %vm226_vm0, %v218_v34 }
  0x3b   : > { %1023 = vmatpush3.bf16.xpose.msk.msra.mxu0 %vm1304_vm1, %v1018_v18  ;;  %1067 = vmatpush3.bf16.xpose.msk.msra.mxu1 %vm1304_vm1, %v1036_v39 }
  0x3c   : > { %1026 = vmatprep.subr.msk.bf16.mxu0 %vm1304_vm1, %v1024_v25  ;;  %1060 = vmatprep.subr.msk.bf16.mxu1 %vm1304_vm1, %v1042_v43 }
  0x3d   : > { %937 = vmatmul.mubr.msk.f32.gmra.mrb[12].mxu0 %vm226_vm0, %v219_v37 }
  0x3e   : > { %939 = vmatprep.mubr.msk.f32.mxu0 %vm226_vm0, %v220_v38 }
  0x41   : > { %940 = vmatmul.mubr.msk.f32.gmra.mrb[14].mxu0 %vm226_vm0, %v221_v40 }
  0x43   : > { %1029 = vmatpush3.bf16.xpose.msk.msra.mxu0 %vm1304_vm1, %v1024_v25  ;;  %1068 = vmatpush3.bf16.xpose.msk.msra.mxu1 %vm1304_vm1, %v1042_v43 }
  0x44   : > { %1032 = vmatprep.subr.msk.bf16.mxu0 %vm1304_vm1, %v1030_v32  ;;  %1061 = vmatprep.subr.msk.bf16.mxu1 %vm1304_vm1, %v1048_v46 }
  0x4b   : > { %1035 = vmatpush3.bf16.xpose.msk.msra.mxu0 %vm1304_vm1, %v1030_v32  ;;  %1069 = vmatpush3.bf16.xpose.msk.msra.mxu1 %vm1304_vm1, %v1048_v46 }
  0x4c   : > { %1038 = vmatprep.subr.msk.bf16.mxu0 %vm1304_vm1, %v1036_v39 }
  0x53   : > { %1041 = vmatpush3.bf16.xpose.msk.msra.mxu0 %vm1304_vm1, %v1036_v39 }
  0x54   : > { %1044 = vmatprep.subr.msk.bf16.mxu0 %vm1304_vm1, %v1042_v43 }
  0x5b   : > { %1047 = vmatpush3.bf16.xpose.msk.msra.mxu0 %vm1304_vm1, %v1042_v43 }
  0x5c   : > { %1050 = vmatprep.subr.msk.bf16.mxu0 %vm1304_vm1, %v1048_v46 }
  0x63   : > { %1053 = vmatpush3.bf16.xpose.msk.msra.mxu0 %vm1304_vm1, %v1048_v46 }
  0xf8   : > { %v920_v47 = vpop.f32.mrb[0].mxu0 }
  0xf9   : > { %v341_v48 = vpop.f32.mrb[1].mxu0 }
  0xfa   : > { %974 = vmatprep.mubr.msk.f32.mxu0 %vm226_vm0, %v341_v48 }
  0xfb   : > { %975 = vmatmul.mubr.msk.f32.vlgmr.msra.gmra.mrb[16].mxu0 %vm226_vm0, %v920_v47 }
  0xfc   : > { %v923_v49 = vpop.f32.mrb[2].mxu0 }
  0xfd   : > { %v351_v50 = vpop.f32.mrb[3].mxu0 }
  0xfe   : > { %977 = vmatprep.mubr.msk.f32.mxu0 %vm226_vm0, %v351_v50 }
  0xff   : > { %978 = vmatmul.mubr.msk.f32.gmra.mrb[18].mxu0 %vm226_vm0, %v923_v49 }
 0x100   : > { %v926_v51 = vpop.f32.mrb[4].mxu0 }
 0x101   : > { %v361_v52 = vpop.f32.mrb[5].mxu0 }
 0x102   : > { %980 = vmatprep.mubr.msk.f32.mxu0 %vm226_vm0, %v361_v52 }
 0x103   : > { %981 = vmatmul.mubr.msk.f32.gmra.mrb[20].mxu0 %vm226_vm0, %v926_v51 }
 0x104   : > { %v929_v53 = vpop.f32.mrb[6].mxu0 }
 0x105   : > { %v371_v54 = vpop.f32.mrb[7].mxu0 }
 0x106   : > { %983 = vmatprep.mubr.msk.f32.mxu1 %vm226_vm0, %v371_v54 }
 0x107   : > { %984 = vmatmul.mubr.msk.f32.vlgmr.msra.gmra.mrb[0].mxu1 %vm226_vm0, %v929_v53 }
 0x108   : > { %v932_v55 = vpop.f32.mrb[8].mxu0 }
 0x109   : > { %v381_v56 = vpop.f32.mrb[9].mxu0 }
 0x10a   : > { %986 = vmatprep.mubr.msk.f32.mxu1 %vm226_vm0, %v381_v56 }
 0x10b   : > { %987 = vmatmul.mubr.msk.f32.gmra.mrb[2].mxu1 %vm226_vm0, %v932_v55 }
 0x10c   : > { %v935_v57 = vpop.f32.mrb[10].mxu0 }
 0x10d   : > { %v391_v58 = vpop.f32.mrb[11].mxu0 }
 0x10e   : > { %989 = vmatprep.mubr.msk.f32.mxu1 %vm226_vm0, %v391_v58 }
 0x10f   : > { %990 = vmatmul.mubr.msk.f32.gmra.mrb[4].mxu1 %vm226_vm0, %v935_v57 }
 0x110   : > { %v938_v59 = vpop.f32.mrb[12].mxu0 }
 0x111   : > { %v401_v60 = vpop.f32.mrb[13].mxu0 }
 0x112   : > { %992 = vmatprep.mubr.msk.f32.mxu1 %vm226_vm0, %v401_v60 }
 0x113   : > { %993 = vmatmul.mubr.msk.f32.gmra.mrb[6].mxu1 %vm226_vm0, %v938_v59 }
 0x114   : > { %v941_v61 = vpop.f32.mrb[14].mxu0 }
 0x115   : > { %v411_v62 = vpop.f32.mrb[15].mxu0 }
 0x116   : > { %995 = vmatprep.mubr.msk.f32.mxu1 %vm226_vm0, %v411_v62 }
 0x117   : > { %996 = vmatmul.mubr.msk.f32.gmra.mrb[8].mxu1 %vm226_vm0, %v941_v61 }
 0x1ce   : > { %v976_v63 = vpop.f32.mrb[16].mxu0 }
 0x1cf   : > { %678 = vst [vmem:[%s1493_s29 + $0x8] sm:$0xff] %v976_v63  ;;  %v598_v0 = vpop.f32.mrb[17].mxu0 }
 0x1d0   : > { %677 = vst [vmem:[%s1493_s29] sm:$0xff] %v598_v0 }
 0x1d2   : > { %v979_v1 = vpop.f32.mrb[18].mxu0 }
 0x1d3   : > { %680 = vst [vmem:[%s1493_s29 + $0x18] sm:$0xff] %v979_v1  ;;  %v608_v2 = vpop.f32.mrb[19].mxu0 }
 0x1d4   : > { %679 = vst [vmem:[%s1493_s29 + $0x10] sm:$0xff] %v608_v2 }
 0x1d6   : > { %v982_v3 = vpop.f32.mrb[20].mxu0 }
 0x1d7   : > { %682 = vst [vmem:[%s1493_s29 + $0x28] sm:$0xff] %v982_v3  ;;  %v618_v4 = vpop.f32.mrb[21].mxu0 }
 0x1d8   : > { %681 = vst [vmem:[%s1493_s29 + $0x20] sm:$0xff] %v618_v4 }
 0x1da   : > { %v985_v5 = vpop.f32.mrb[0].mxu1 }
 0x1db   : > { %684 = vst [vmem:[%s1493_s29 + $0x38] sm:$0xff] %v985_v5  ;;  %v628_v6 = vpop.f32.mrb[1].mxu1 }
 0x1dc   : > { %683 = vst [vmem:[%s1493_s29 + $0x30] sm:$0xff] %v628_v6 }
 0x1de   : > { %v988_v7 = vpop.f32.mrb[2].mxu1 }
 0x1df   : > { %686 = vst [vmem:[%s1493_s29 + $0x48] sm:$0xff] %v988_v7  ;;  %v638_v8 = vpop.f32.mrb[3].mxu1 }
 0x1e0   : > { %685 = vst [vmem:[%s1493_s29 + $0x40] sm:$0xff] %v638_v8 }
 0x1e2   : > { %v991_v9 = vpop.f32.mrb[4].mxu1 }
 0x1e3   : > { %688 = vst [vmem:[%s1493_s29 + $0x58] sm:$0xff] %v991_v9  ;;  %v648_v10 = vpop.f32.mrb[5].mxu1 }
 0x1e4   : > { %687 = vst [vmem:[%s1493_s29 + $0x50] sm:$0xff] %v648_v10 }
 0x1e6   : > { %v994_v11 = vpop.f32.mrb[6].mxu1 }
 0x1e7   : > { %690 = vst [vmem:[%s1493_s29 + $0x68] sm:$0xff] %v994_v11  ;;  %v658_v12 = vpop.f32.mrb[7].mxu1 }
 0x1e8   : > { %689 = vst [vmem:[%s1493_s29 + $0x60] sm:$0xff] %v658_v12 }
 0x1ea   : > { %v997_v13 = vpop.f32.mrb[8].mxu1 }
 0x1eb   : > { %692 = vst [vmem:[%s1493_s29 + $0x78] sm:$0xff] %v997_v13  ;;  %v668_v14 = vpop.f32.mrb[9].mxu1 }
 0x1ec   : > { %691 = vst [vmem:[%s1493_s29 + $0x70] sm:$0xff] %v668_v14 }
 0x1ed   : > { %1141 = shalt.err (!%p1138_p5)
}
 0x1ee   : > { %s1142_s18 = scalar_lea.hbm %s1514_s7, 2048  ;;  %s1146_s23 = scalar_lea.hbm %s1571_s3, 8192 }
 0x1ef   : > { %p1143_p6 = scmp.ne.s32.totalorder %s1514_s7, %s1142_s18  ;;  %p1147_p10 = scmp.lt.u32.totalorder %s1514_s7, %s1571_s3 }
 0x1f0   : > { %p1148_p11 = scmp.lt.u32.totalorder %s1146_s23, %s1142_s18  ;;  %p1150_p13 = scmp.lt.u32.totalorder %s1142_s18, %s1514_s7 }
 0x1f1   : > { %p1144_p7 = pnand %p1143_p6, %p1272_p4 }
 0x1f2   : > { %p1149_p12 = por %p1148_p11, %p1147_p10 }
 0x1f3   : > { %p1145_p9 = pneg %p1144_p7 }
 0x1f4   : > { %p1151_p0 = por %p1150_p13, %p1149_p12 }
 0x1f6   : > { %p1152_p1 = pnand %p1151_p0, %p1145_p9 }
 0x1f8   : > { %1155 = shalt.err (!%p1152_p1)
}
 0x1f9   : > { %s1209_s28 = smov 128   ;;  %s1210_s29 = smov 512  }
 0x1fa   : > { %s1211_s30 = smov 8  }
 0x1fb   : > { %1070 = dma.vmem_to_hbm [thread:$0]  (%p1272_p4), %s1516_s4, 2048, %s1514_s7, %s1522_s15, %s1209_s28, %s1210_s29, %s1211_s30  }
 0x1fc PF: > { %p1076_p2 = scmp.ge.s32.totalorder %s1206_s17, 2  ;;  %s724_s5 = sand.u32 1, %s1186_s12  }
 0x1fd   : > { %s725_s6 = scalar_lea.sflag [#allocation3], %s724_s5 }
 0x1fe   : > { %p1073_p3 = pnand %p1076_p2, %p1279_p8 }
 0x200   : > { %1181 = dma.done.wait (!%p1073_p3), %s725_s6, 2048  }
 0x201   : > { %1183 = vsyncadd (!%p1073_p3), %s725_s6, 4294965248  ;;  %s16_s17 = sadd.s32 1, %s1206_s17   ;;  %s1576_s12 = smov %s1190_s13 }
 0x202   : > { %p13_p5 = scmp.ge.s32.totalorder %s16_s17, 6   ;;  %s1577_s13 = smov %s1194_s14 }
 0x203   : > { %s1578_s14 = smov %s1285_s25  ;;  %s1579_s15 = smov %s1202_s16 }
 0x204   : > { %s1580_s16 = smov %s1582_s20  ;;  %15 = sbr.rel (!%p13_p5) target bundleno = 4 (0x4), region = 70 }
 0x20b   :  { %730 = vsyncpa [#allocation3], 1 }
 0x20c   :  { %732 = vsyncpa [#allocation3 + $0x1], 1 }

</bundles_post_ra>
